<compile_context>
chip_gen: v7x
topology: tpu7x:2x2x1
jax: 0.10.0
libtpu: 0.0.40
codegen_flags: <defaults>
</compile_context>

<pallas_src>
import jax
import jax.numpy as jnp
from jax.experimental import pallas as pl
from jax.experimental.pallas import tpu as pltpu

_LOG2E = 1.4426950408889634


# --------------------------------------------------------------------------- #
# Flash-attention kernel (online softmax over the kv axis, heads batched by G) #
# --------------------------------------------------------------------------- #
def _flash_attn_kernel(q_ref, k_ref, v_ref, o_ref, m_scr, l_scr, acc_scr):
    """Grid = (batch, head_group, q_tile, kv_tile).

    Block views:
      q_ref : (1, G, tq, Dh)   k_ref / v_ref : (1, G, tk, Dh)   o_ref : (1, G, tq, Dh)
    Scratch (f32, carried across kv steps): m (G,tq,1), l (G,tq,1), acc (G,tq,Dh).
    q already carries softmax_scale * log2(e), so exp() becomes exp2().
    """
    ki = pl.program_id(3)
    nk = pl.num_programs(3)

    @pl.when(ki == 0)
    def _():
        m_scr[...] = jnp.full_like(m_scr, -jnp.inf)
        l_scr[...] = jnp.zeros_like(l_scr)
        acc_scr[...] = jnp.zeros_like(acc_scr)

    q = q_ref[0]                                   # (G, tq, Dh) bf16, pre-scaled
    k = k_ref[0]                                   # (G, tk, Dh) bf16
    v = v_ref[0]                                   # (G, tk, Dh) bf16

    # Batched per-head QK^T (batch over G heads, contract Dh), f32 accumulation.
    s = jnp.einsum('gqd,gkd->gqk', q, k,
                   preferred_element_type=jnp.float32)      # (G, tq, tk) f32

    # Online softmax in the log2 domain (scale*log2e folded into Wq upstream).
    m_prev = m_scr[...]
    m_new = jnp.maximum(m_prev, jnp.max(s, axis=-1, keepdims=True))
    alpha = jnp.exp2(m_prev - m_new)
    p = jnp.exp2(s - m_new)
    l_scr[...] = alpha * l_scr[...] + jnp.sum(p, axis=-1, keepdims=True)
    acc_scr[...] = alpha * acc_scr[...] + jnp.einsum(
        'gqk,gkd->gqd', p.astype(v.dtype), v,
        preferred_element_type=jnp.float32)
    m_scr[...] = m_new

    # Last kv tile: normalize and emit this (batch, head-group, q-tile) block.
    @pl.when(ki == nk - 1)
    def _():
        inv_l = pl.reciprocal(l_scr[...], approx=False)   # exact: once per (q, hg)
        o_ref[0] = (acc_scr[...] * inv_l).astype(o_ref.dtype)


# ----------------------------- helpers ------------------------------------- #
def _pick_tile(n, candidates=(512, 256, 128)):
    """Largest candidate tile dividing n; fall back to the full (untiled) length."""
    for t in candidates:
        if n % t == 0:
            return t
    return n


def _pick_head_group(heads, dim_head, target_lanes=128):
    """Heads per grid step: aim for G*dim_head >= 128 lanes, G must divide heads."""
    g = max(1, min(heads, target_lanes // max(dim_head, 1)))
    while heads % g:
        g -= 1
    return g


def _vmem_limit_bytes():
    """Generation-aware scoped-VMEM budget (v7x: 64 MiB/TC, v5e/v6e: 128 MiB)."""
    cap = None
    try:
        cap = getattr(pltpu.get_tpu_info(), "vmem_capacity_bytes", None)
    except Exception:
        cap = None
    if not cap:
        cap = 64 * 1024 * 1024        # conservative: assume v7x per-TC VMEM
    return int(min(cap * 3 // 4, 96 * 1024 * 1024))


def _flash_attention(q, k, v, *, group):
    """q,k,v: (B, H, N|M, Dh) bf16 -> (B, H, N, Dh) attention output."""
    B, H, Nq, Dh = q.shape
    Nk = k.shape[2]
    G = group
    HG = H // G

    tq = _pick_tile(Nq)
    tk = _pick_tile(Nk)

    # v7x megacore: keep at least 2 independent parallel work units when possible.
    if B * HG * (Nq // tq) < 2 and tq >= 256 and Nq % (tq // 2) == 0:
        tq //= 2

    nq = Nq // tq
    nk = Nk // tk

    return pl.pallas_call(
        _flash_attn_kernel,
        out_shape=jax.ShapeDtypeStruct((B, H, Nq, Dh), q.dtype),
        grid_spec=pltpu.PrefetchScalarGridSpec(
            num_scalar_prefetch=0,
            grid=(B, HG, nq, nk),
            in_specs=[
                pl.BlockSpec((1, G, tq, Dh), lambda b, hg, qi, ki: (b, hg, qi, 0)),
                pl.BlockSpec((1, G, tk, Dh), lambda b, hg, qi, ki: (b, hg, ki, 0)),
                pl.BlockSpec((1, G, tk, Dh), lambda b, hg, qi, ki: (b, hg, ki, 0)),
            ],
            out_specs=pl.BlockSpec((1, G, tq, Dh),
                                   lambda b, hg, qi, ki: (b, hg, qi, 0)),
            scratch_shapes=[
                pltpu.VMEM((G, tq, 1), jnp.float32),    # running max
                pltpu.VMEM((G, tq, 1), jnp.float32),    # running sum
                pltpu.VMEM((G, tq, Dh), jnp.float32),   # attention accumulator
            ],
        ),
        compiler_params=pltpu.CompilerParams(
            dimension_semantics=("parallel", "parallel", "parallel", "arbitrary"),
            vmem_limit_bytes=_vmem_limit_bytes(),
        ),
    )(q, k, v)


# ----------------------------- module forward ------------------------------- #
def attention_pallas(x, wq, wkv, wout, bout, *, heads, dim_head,
                     context=None, compute_dtype=jnp.bfloat16):
    """Mirrors Attention.forward(x, context, mask=None).

    Weights are stored (in_dim, out_dim): wq (D, H*Dh), wkv (Dc, 2*H*Dh),
    wout (H*Dh, D), bout (D,).
    """
    B, N, D = x.shape
    inner = heads * dim_head
    ctx = x if context is None else context
    M = ctx.shape[1]
    scale = dim_head ** (-0.5)

    # Fold softmax scale AND log2(e) into Wq in f32 (before the bf16 cast) so the
    # kernel uses exp2 and never rescales the score tile.
    wq_s = (wq * (scale * _LOG2E)).astype(compute_dtype)
    wk_c = wkv[:, :inner].astype(compute_dtype)
    wv_c = wkv[:, inner:].astype(compute_dtype)

    x_c = x.astype(compute_dtype)
    ctx_c = ctx.astype(compute_dtype)

    # Q/K/V projections once (full-width MXU contractions over D), f32 accumulate.
    q = jnp.einsum('bnd,df->bnf', x_c, wq_s, preferred_element_type=jnp.float32)
    k = jnp.einsum('bmd,df->bmf', ctx_c, wk_c, preferred_element_type=jnp.float32)
    v = jnp.einsum('bmd,df->bmf', ctx_c, wv_c, preferred_element_type=jnp.float32)

    def split_heads(t, n):   # b n (h d) -> b h n d
        return (t.reshape(B, n, heads, dim_head)
                 .transpose(0, 2, 1, 3)
                 .astype(compute_dtype))

    qh, kh, vh = split_heads(q, N), split_heads(k, M), split_heads(v, M)

    G = _pick_head_group(heads, dim_head)
    attn = _flash_attention(qh, kh, vh, group=G)          # (B, H, N, Dh) bf16

    # Merge heads and apply the output projection (inner-wide contraction) + bias.
    out = attn.transpose(0, 2, 1, 3).reshape(B, N, inner)
    y = jnp.einsum('bni,io->bno', out, wout.astype(compute_dtype),
                   preferred_element_type=jnp.float32) + bout.astype(jnp.float32)
    return y.astype(x.dtype)


# ----------------------------- pure-JAX reference ---------------------------- #
def attention_ref(x, wq, wkv, wout, bout, *, heads, dim_head):
    B, N, D = x.shape
    inner = heads * dim_head
    q = x @ wq
    kv = x @ wkv
    k, v = kv[..., :inner], kv[..., inner:]

    def split(t):  # b n (h d) -> b h n d
        return t.reshape(B, N, heads, dim_head).transpose(0, 2, 1, 3)

    q, k, v = split(q), split(k), split(v)
    sim = jnp.einsum('bhid,bhjd->bhij', q, k) * (dim_head ** -0.5)
    attn = jax.nn.softmax(sim, axis=-1)
    out = jnp.einsum('bhij,bhjd->bhid', attn, v)
    out = out.transpose(0, 2, 1, 3).reshape(B, N, inner)
    return out @ wout + bout


# ----------------------------- tests ----------------------------------------- #
def _run_case(key, B, N, query_dim, heads, dim_head):
    inner = heads * dim_head
    kx, kq, kkv, kw, kb = jax.random.split(key, 5)
    x = jax.random.normal(kx, (B, N, query_dim), dtype=jnp.float32)
    wq = jax.random.normal(kq, (query_dim, inner), dtype=jnp.float32) * 0.05
    wkv = jax.random.normal(kkv, (query_dim, 2 * inner), dtype=jnp.float32) * 0.05
    wout = jax.random.normal(kw, (inner, query_dim), dtype=jnp.float32) * 0.05
    bout = jax.random.normal(kb, (query_dim,), dtype=jnp.float32) * 0.05

    out = attention_pallas(x, wq, wkv, wout, bout, heads=heads, dim_head=dim_head)
    out = jax.block_until_ready(out)
    ref = attention_ref(x, wq, wkv, wout, bout, heads=heads, dim_head=dim_head)

    assert out.shape == (B, N, query_dim)
    # bf16 matmul inputs (f32 accumulation) -> relaxed tolerance vs f32 reference.
    assert jnp.allclose(out, ref, rtol=2e-2, atol=2e-2), "mismatch vs JAX reference"


if __name__ == "__main__":
    key = jax.random.PRNGKey(0)
    k1, k2, k3 = jax.random.split(key, 3)

    # Small single-tile path (G = heads, one head group).
    _run_case(k1, B=2, N=8, query_dim=32, heads=4, dim_head=16)
    # Tiled flash path: multiple q / kv tiles along the sequence.
    _run_case(k2, B=1, N=384, query_dim=32, heads=2, dim_head=16)
    # Multiple head groups (heads=4, dim_head=64 -> G=2, 2 head groups, 128 lanes).
    _run_case(k3, B=1, N=128, query_dim=64, heads=4, dim_head=64)

    print("KERNEL_OK")
</pallas_src>

<mosaic_0001>
module attributes {stable_mosaic.version = 11 : i64} {
  func.func @_flash_attn_kernel(%arg0: i32, %arg1: i32, %arg2: i32, %arg3: i32, %arg4: memref<1x4x8x16xbf16, #tpu.memory_space<vmem>>, %arg5: memref<1x4x8x16xbf16, #tpu.memory_space<vmem>>, %arg6: memref<1x4x8x16xbf16, #tpu.memory_space<vmem>>, %arg7: memref<1x4x8x16xbf16, #tpu.memory_space<vmem>>, %arg8: memref<4x8x1xf32, #tpu.memory_space<vmem>>, %arg9: memref<4x8x1xf32, #tpu.memory_space<vmem>>, %arg10: memref<4x8x16xf32, #tpu.memory_space<vmem>>) attributes {dimension_semantics = [#tpu.dimension_semantics<parallel>, #tpu.dimension_semantics<parallel>, #tpu.dimension_semantics<parallel>, #tpu.dimension_semantics<arbitrary>], iteration_bounds = array<i64: 2, 1, 1, 1>, scalar_prefetch = 0 : i64, scratch_operands = 3 : i64, tpu.core_type = #tpu.core_type<tc>, window_params = [{transform_indices = @transform_0, window_bounds = array<i64: 1, 4, 8, 16>}, {transform_indices = @transform_1, window_bounds = array<i64: 1, 4, 8, 16>}, {transform_indices = @transform_2, window_bounds = array<i64: 1, 4, 8, 16>}, {transform_indices = @transform_3, window_bounds = array<i64: 1, 4, 8, 16>}]} {
    %c0_i32 = arith.constant 0 : i32
    %0 = arith.cmpi eq, %arg3, %c0_i32 : i32
    %1 = arith.extui %0 : i1 to i32
    %c0_i32_0 = arith.constant 0 : i32
    %2 = arith.cmpi ne, %1, %c0_i32_0 : i32
    scf.if %2 {
      %cst_35 = arith.constant 0xFF800000 : f32
      %36 = vector.broadcast %cst_35 : f32 to vector<4x8x1xf32>
      %c0_36 = arith.constant 0 : index
      %c0_37 = arith.constant 0 : index
      %c0_38 = arith.constant 0 : index
      %37 = vector.load %arg8[%c0_36, %c0_37, %c0_38] : memref<4x8x1xf32, #tpu.memory_space<vmem>>, vector<4x8x1xf32>
      tpu.vector_store %arg8[%c0_36, %c0_37, %c0_38], %36 {strides = array<i32>} : memref<4x8x1xf32, #tpu.memory_space<vmem>>, vector<4x8x1xf32>,
      %cst_39 = arith.constant 0.000000e+00 : f32
      %38 = vector.broadcast %cst_39 : f32 to vector<4x8x1xf32>
      %c0_40 = arith.constant 0 : index
      %c0_41 = arith.constant 0 : index
      %c0_42 = arith.constant 0 : index
      %39 = vector.load %arg9[%c0_40, %c0_41, %c0_42] : memref<4x8x1xf32, #tpu.memory_space<vmem>>, vector<4x8x1xf32>
      tpu.vector_store %arg9[%c0_40, %c0_41, %c0_42], %38 {strides = array<i32>} : memref<4x8x1xf32, #tpu.memory_space<vmem>>, vector<4x8x1xf32>,
      %cst_43 = arith.constant 0.000000e+00 : f32
      %40 = vector.broadcast %cst_43 : f32 to vector<4x8x16xf32>
      %c0_44 = arith.constant 0 : index
      %c0_45 = arith.constant 0 : index
      %c0_46 = arith.constant 0 : index
      %41 = vector.load %arg10[%c0_44, %c0_45, %c0_46] : memref<4x8x16xf32, #tpu.memory_space<vmem>>, vector<4x8x16xf32>
      tpu.vector_store %arg10[%c0_44, %c0_45, %c0_46], %40 {strides = array<i32>} : memref<4x8x16xf32, #tpu.memory_space<vmem>>, vector<4x8x16xf32>,
    } else {
    }
    %c0 = arith.constant 0 : index
    %c0_1 = arith.constant 0 : index
    %c0_2 = arith.constant 0 : index
    %c0_3 = arith.constant 0 : index
    %3 = vector.load %arg4[%c0, %c0_1, %c0_2, %c0_3] : memref<1x4x8x16xbf16, #tpu.memory_space<vmem>>, vector<1x4x8x16xbf16>
    %4 = vector.shape_cast %3 : vector<1x4x8x16xbf16> to vector<4x8x16xbf16>
    %c0_4 = arith.constant 0 : index
    %c0_5 = arith.constant 0 : index
    %c0_6 = arith.constant 0 : index
    %c0_7 = arith.constant 0 : index
    %5 = vector.load %arg5[%c0_4, %c0_5, %c0_6, %c0_7] : memref<1x4x8x16xbf16, #tpu.memory_space<vmem>>, vector<1x4x8x16xbf16>
    %6 = vector.shape_cast %5 : vector<1x4x8x16xbf16> to vector<4x8x16xbf16>
    %c0_8 = arith.constant 0 : index
    %c0_9 = arith.constant 0 : index
    %c0_10 = arith.constant 0 : index
    %c0_11 = arith.constant 0 : index
    %7 = vector.load %arg6[%c0_8, %c0_9, %c0_10, %c0_11] : memref<1x4x8x16xbf16, #tpu.memory_space<vmem>>, vector<1x4x8x16xbf16>
    %8 = vector.shape_cast %7 : vector<1x4x8x16xbf16> to vector<4x8x16xbf16>
    "tpu.trace_start"() <{level = 10 : i32, message = "gqd,gkd->gqk"}> : () -> ()
    %cst = arith.constant dense<0.000000e+00> : vector<4x8x8xf32>
    %9 = tpu.matmul %4, %6, %cst {dimension_numbers = #tpu.dot_dimension_numbers<[2], [2], [1], [1], [0, 0, 0, 1, 1, 1], [0], [0]>} : vector<4x8x16xbf16>, vector<4x8x16xbf16>, vector<4x8x8xf32> -> vector<4x8x8xf32>
    "tpu.trace_stop"() : () -> ()
    %c0_12 = arith.constant 0 : index
    %c0_13 = arith.constant 0 : index
    %c0_14 = arith.constant 0 : index
    %10 = vector.load %arg8[%c0_12, %c0_13, %c0_14] : memref<4x8x1xf32, #tpu.memory_space<vmem>>, vector<4x8x1xf32>
    %cst_15 = arith.constant dense<0xFF800000> : vector<4x8xf32>
    %11 = vector.multi_reduction <maximumf>, %9, %cst_15 [2] : vector<4x8x8xf32> to vector<4x8xf32>
    %12 = vector.shape_cast %11 : vector<4x8xf32> to vector<4x8x1xf32>
    %13 = arith.maximumf %10, %12 : vector<4x8x1xf32>
    %14 = arith.subf %10, %13 : vector<4x8x1xf32>
    %15 = math.exp2 %14 : vector<4x8x1xf32>
    %16 = vector.broadcast %13 : vector<4x8x1xf32> to vector<4x8x8xf32>
    %17 = arith.subf %9, %16 : vector<4x8x8xf32>
    %18 = math.exp2 %17 : vector<4x8x8xf32>
    %c0_16 = arith.constant 0 : index
    %c0_17 = arith.constant 0 : index
    %c0_18 = arith.constant 0 : index
    %19 = vector.load %arg9[%c0_16, %c0_17, %c0_18] : memref<4x8x1xf32, #tpu.memory_space<vmem>>, vector<4x8x1xf32>
    %20 = arith.mulf %15, %19 : vector<4x8x1xf32>
    %cst_19 = arith.constant dense<0.000000e+00> : vector<4x8xf32>
    %21 = vector.multi_reduction <add>, %18, %cst_19 [2] : vector<4x8x8xf32> to vector<4x8xf32>
    %22 = vector.shape_cast %21 : vector<4x8xf32> to vector<4x8x1xf32>
    %23 = arith.addf %20, %22 : vector<4x8x1xf32>
    %c0_20 = arith.constant 0 : index
    %c0_21 = arith.constant 0 : index
    %c0_22 = arith.constant 0 : index
    %24 = vector.load %arg9[%c0_20, %c0_21, %c0_22] : memref<4x8x1xf32, #tpu.memory_space<vmem>>, vector<4x8x1xf32>
    tpu.vector_store %arg9[%c0_20, %c0_21, %c0_22], %23 {strides = array<i32>} : memref<4x8x1xf32, #tpu.memory_space<vmem>>, vector<4x8x1xf32>,
    %c0_23 = arith.constant 0 : index
    %c0_24 = arith.constant 0 : index
    %c0_25 = arith.constant 0 : index
    %25 = vector.load %arg10[%c0_23, %c0_24, %c0_25] : memref<4x8x16xf32, #tpu.memory_space<vmem>>, vector<4x8x16xf32>
    %26 = vector.broadcast %15 : vector<4x8x1xf32> to vector<4x8x16xf32>
    %27 = arith.mulf %26, %25 : vector<4x8x16xf32>
    %28 = arith.truncf %18 : vector<4x8x8xf32> to vector<4x8x8xbf16>
    "tpu.trace_start"() <{level = 10 : i32, message = "gqk,gkd->gqd"}> : () -> ()
    %cst_26 = arith.constant dense<0.000000e+00> : vector<4x8x16xf32>
    %29 = tpu.matmul %28, %8, %cst_26 {dimension_numbers = #tpu.dot_dimension_numbers<[2], [1], [1], [2], [0, 0, 0, 1, 1, 2], [0], [0]>} : vector<4x8x8xbf16>, vector<4x8x16xbf16>, vector<4x8x16xf32> -> vector<4x8x16xf32>
    "tpu.trace_stop"() : () -> ()
    %30 = arith.addf %27, %29 : vector<4x8x16xf32>
    %c0_27 = arith.constant 0 : index
    %c0_28 = arith.constant 0 : index
    %c0_29 = arith.constant 0 : index
    %31 = vector.load %arg10[%c0_27, %c0_28, %c0_29] : memref<4x8x16xf32, #tpu.memory_space<vmem>>, vector<4x8x16xf32>
    tpu.vector_store %arg10[%c0_27, %c0_28, %c0_29], %30 {strides = array<i32>} : memref<4x8x16xf32, #tpu.memory_space<vmem>>, vector<4x8x16xf32>,
    %c0_30 = arith.constant 0 : index
    %c0_31 = arith.constant 0 : index
    %c0_32 = arith.constant 0 : index
    %32 = vector.load %arg8[%c0_30, %c0_31, %c0_32] : memref<4x8x1xf32, #tpu.memory_space<vmem>>, vector<4x8x1xf32>
    tpu.vector_store %arg8[%c0_30, %c0_31, %c0_32], %13 {strides = array<i32>} : memref<4x8x1xf32, #tpu.memory_space<vmem>>, vector<4x8x1xf32>,
    %c0_i32_33 = arith.constant 0 : i32
    %33 = arith.cmpi eq, %arg3, %c0_i32_33 : i32
    %34 = arith.extui %33 : i1 to i32
    %c0_i32_34 = arith.constant 0 : i32
    %35 = arith.cmpi ne, %34, %c0_i32_34 : i32
    scf.if %35 {
      %c0_35 = arith.constant 0 : index
      %c0_36 = arith.constant 0 : index
      %c0_37 = arith.constant 0 : index
      %36 = vector.load %arg9[%c0_35, %c0_36, %c0_37] : memref<4x8x1xf32, #tpu.memory_space<vmem>>, vector<4x8x1xf32>
      %37 = tpu.reciprocal %36 : vector<4x8x1xf32> -> vector<4x8x1xf32>
      %c0_38 = arith.constant 0 : index
      %c0_39 = arith.constant 0 : index
      %c0_40 = arith.constant 0 : index
      %38 = vector.load %arg10[%c0_38, %c0_39, %c0_40] : memref<4x8x16xf32, #tpu.memory_space<vmem>>, vector<4x8x16xf32>
      %39 = vector.broadcast %37 : vector<4x8x1xf32> to vector<4x8x16xf32>
      %40 = arith.mulf %38, %39 : vector<4x8x16xf32>
      %41 = arith.truncf %40 : vector<4x8x16xf32> to vector<4x8x16xbf16>
      %c0_41 = arith.constant 0 : index
      %c0_42 = arith.constant 0 : index
      %c0_43 = arith.constant 0 : index
      %c0_44 = arith.constant 0 : index
      %42 = vector.load %arg7[%c0_41, %c0_42, %c0_43, %c0_44] : memref<1x4x8x16xbf16, #tpu.memory_space<vmem>>, vector<1x4x8x16xbf16>
      %43 = vector.shape_cast %42 : vector<1x4x8x16xbf16> to vector<4x8x16xbf16>
      %44 = vector.shape_cast %41 : vector<4x8x16xbf16> to vector<1x4x8x16xbf16>
      tpu.vector_store %arg7[%c0_41, %c0_42, %c0_43, %c0_44], %44 {strides = array<i32>} : memref<1x4x8x16xbf16, #tpu.memory_space<vmem>>, vector<1x4x8x16xbf16>,
    } else {
    }
    return
  }
  func.func @transform_0(%arg0: i32, %arg1: i32, %arg2: i32, %arg3: i32) -> (i32, i32, i32, i32) {
    %c0_i32 = arith.constant 0 : i32
    %c0_i32_0 = arith.constant 0 : i32
    return %arg0, %arg1, %arg2, %c0_i32 : i32, i32, i32, i32
  }
  func.func @transform_1(%arg0: i32, %arg1: i32, %arg2: i32, %arg3: i32) -> (i32, i32, i32, i32) {
    %c0_i32 = arith.constant 0 : i32
    %c0_i32_0 = arith.constant 0 : i32
    return %arg0, %arg1, %arg3, %c0_i32 : i32, i32, i32, i32
  }
  func.func @transform_2(%arg0: i32, %arg1: i32, %arg2: i32, %arg3: i32) -> (i32, i32, i32, i32) {
    %c0_i32 = arith.constant 0 : i32
    %c0_i32_0 = arith.constant 0 : i32
    return %arg0, %arg1, %arg3, %c0_i32 : i32, i32, i32, i32
  }
  func.func @transform_3(%arg0: i32, %arg1: i32, %arg2: i32, %arg3: i32) -> (i32, i32, i32, i32) {
    %c0_i32 = arith.constant 0 : i32
    %c0_i32_0 = arith.constant 0 : i32
    return %arg0, %arg1, %arg2, %c0_i32 : i32, i32, i32, i32
  }
}

</mosaic_0001>

<bundles_post_ra>
// kernel: tpu_custom_call.1
= control target key start
LH: loop header
LB: loop body
LE: loop exit
PB: predicated region body
PF: predicated region fallthrough
CT: control target
= control target key end

     0   :  { %s1892_s0 = inlined_call_operand.hbm [shape: bf16[2,4,8,16], index: 0, kind: input, shape index: {}]   ;;  %s1893_s1 = inlined_call_operand.hbm [shape: bf16[2,4,8,16], index: 1, kind: input, shape index: {}]   ;;  %s1894_s2 = inlined_call_operand.hbm [shape: bf16[2,4,8,16], index: 2, kind: input, shape index: {}]   ;;  %s1895_s3 = inlined_call_operand.hbm [shape: bf16[2,4,8,16], index: 3, kind: output, shape index: {}]  }
   0x1   :  { %1905 = sst [smem:[#allocation18_spill]] %s1893_s1 }
   0x2   :  { %8 = vsyncpa [#allocation6], 0 }
   0x3   :  { %10 = vsyncpa [#allocation6 + $0x1], 0 }
   0x4   :  { %11 = vsyncpa [#allocation9], 0 }
   0x5   :  { %13 = vsyncpa [#allocation9 + $0x1], 0 }
   0x6   :  { %14 = vsyncpa [#allocation7], 0 }
   0x7   :  { %16 = vsyncpa [#allocation7 + $0x1], 0  ;;  %s1478_s12 = smov 0   ;;  %s1480_s13 = smov 0  }
   0x8   :  { %s1482_s14 = smov 0   ;;  %s1484_s15 = smov 0  }
   0x9   :  { %s1486_s16 = smov 0   ;;  %s1488_s17 = smov 0  }
   0xa LB: > { %1906 = sst [smem:[#allocation15_spill]] %s1440_s16  ;;  %s1509_s18 = sadd.s32 4294967295, %s1444_s17   ;;  %s1444_s17 = sphi %s1488_s17, %s22_s17   ;;  %s1440_s16 = sphi %s1486_s16, %s1929_s16   ;;  %s1436_s15 = sphi %s1484_s15, %s1928_s15   ;;  %s1432_s14 = sphi %s1482_s14, %s1932_s14   ;;  %s1428_s13 = sphi %s1480_s13, %s1931_s13   ;;  %s1424_s12 = sphi %s1478_s12, %s1930_s12  }
   0xb   : > { %s1064_s19 = sadd.s32 4294967294, %s1444_s17   ;;  %s48_s20 = sadd.s32 1, %s1440_s16 }
   0xc   : > { %s59_s21 = sadd.s32 1, %s1432_s14  ;;  %p50_p0 = scmp.ge.s32.totalorder %s48_s20, 2 }
   0xd   : > { %p66_p1 = scmp.ne.s32.totalorder %s1432_s14, %s1428_s13  ;;  %p67_p2 = scmp.eq.s32.totalorder %s1444_s17, 0 }
   0xe   : > { %p72_p3 = scmp.ne.s32.totalorder %s1428_s13, %s1424_s12  ;;  %s1934_s20 = smov (%p50_p0, %s48_s20), 0 }
   0xf   : > { %1907 = sst [smem:[#allocation16_spill]] %s1934_s20  ;;  %p1521_p4 = por %p67_p2, %p66_p1 }
  0x10   : > { %p73_p5 = scmp.eq.s32.totalorder %s1509_s18, 0  ;;  %s52_s23 = ssub.s32 %s1440_s16, %s1934_s20 }
  0x11   : > { %p160_p6 = scmp.eq.s32.totalorder %s1509_s18, 1  ;;  %p57_p7 = scmp.eq.s32.totalorder %s52_s23, 0 }
  0x12   : > { %p1529_p8 = por %p73_p5, %p72_p3  ;;  %p166_p10 = scmp.eq.s32.totalorder %s1064_s19, 1 }
  0x13   : > { %p1533_p9 = por %p160_p6, %p66_p1  ;;  %p1184_p13 = scmp.lt.s32.totalorder %s1444_s17, 2 }
  0x14   : > { %s1909_s24 = scalar_select %p1529_p8, 1, 0 }
  0x15   : > { %s1910_s25 = scalar_select %p1533_p9, 1, 0 }
  0x16   : > { %s1538_s26 = scalar_select %p57_p7, %s1432_s14, %s59_s21  }
  0x17   : > { %p1540_p11 = por %p166_p10, %p72_p3  ;;  %s1898_s28 = sand.u32 1, %s1432_s14  }
  0x18   : > { %1911 = sst [smem:[#allocation17_spill]] %s1538_s26  ;;  %s1549_s29 = sshll.u32 %s1898_s28, 4 }
  0x19   : > { %s1912_s27 = scalar_select %p1540_p11, 1, 0 }
  0x1a   : > { %s1552_s30 = sshll.u32 %s1440_s16, 8  ;;  %p1556_p0 = pnand %p1184_p13, %p1521_p4 }
  0x1b   : > { %s210_s5 = sand.u32 1, %s1444_s17   ;;  %s1914_s1 = sld [smem:[#allocation18_spill]] }
  0x1c   : > { %s214_s9 = scalar_lea.vmem [#allocation8], %s1549_s29  ;;  %s1572_s11 = scalar_lea.sflag [#allocation9], %s210_s5 }
  0x1d   : > { %s224_s10 = sshll.u32 %s214_s9, 4  ;;  %p1578_p4 = pneg %p1556_p0  ;;  %s1569_s10 = int_to_ptr.vmem [resolvable:$true] %s224_s10 }
  0x21   : > { %s1565_s8 = scalar_lea.hbm %s1914_s1, %s1552_s30  ;;  %s1273_s6 = scalar_lea.hbm %s1914_s1, 512 }
  0x22   : > { %s1268_s19 = scalar_lea.hbm %s1565_s8, 256  ;;  %p1274_p7 = scmp.lt.u32.totalorder %s1565_s8, %s1914_s1 }
  0x23   : > { %p1269_p3 = scmp.ne.s32.totalorder %s1565_s8, %s1268_s19  ;;  %p1275_p10 = scmp.lt.u32.totalorder %s1273_s6, %s1268_s19 }
  0x24   : > { %p1277_p12 = scmp.lt.u32.totalorder %s1268_s19, %s1565_s8 }
  0x25   : > { %p1271_p5 = pnand %p1578_p4, %p1269_p3  ;;  %p1276_p13 = por %p1275_p10, %p1274_p7 }
  0x27   : > { %p1272_p6 = pneg %p1271_p5  ;;  %p1278_p1 = por %p1277_p12, %p1276_p13 }
  0x29   : > { %p1279_p2 = pnand %p1278_p1, %p1272_p6 }
  0x2b   : > { %1282 = shalt.err (!%p1279_p2)
}
  0x2c   : > { %s1283_s5 = scalar_lea.vmem %s1569_s10, 256  ;;  %s1446_s22 = smov [#allocation8]  }
  0x2d   : > { %p1284_p3 = scmp.ne.s32.totalorder %s1569_s10, %s1283_s5  ;;  %s1288_s23 = sshll.u32 %s1446_s22, 4  ;;  %s1289_s23 = int_to_ptr.vmem [resolvable:$false] %s1288_s23 }
  0x2e   : > { %s1290_s7 = scalar_lea.vmem %s1289_s23, 512  ;;  %p1291_p9 = scmp.lt.s32.totalorder %s1569_s10, %s1289_s23 }
  0x2f   : > { %p1286_p5 = pnand %p1284_p3, %p1578_p4  ;;  %p1292_p8 = scmp.lt.s32.totalorder %s1290_s7, %s1283_s5 }
  0x31   : > { %p1287_p11 = pneg %p1286_p5  ;;  %p1293_p7 = por %p1292_p8, %p1291_p9 }
  0x33   : > { %p1294_p10 = pnand %p1293_p7, %p1287_p11 }
  0x35   : > { %1297 = shalt.err (!%p1294_p10)
}
  0x36   : > { %s1899_s19 = smov 64   ;;  %s1901_s6 = smov 4  }
  0x37   : > { %1176 = dma.hbm_to_vmem [thread:$0]  (!%p1556_p0), %s1565_s8, 256, %s1569_s10, %s1572_s11, %s1899_s19, %s1899_s19, %s1901_s6  }
  0x38   : > { %p1916_p8 = scmp.lt.s32.totalorder %s1444_s17, 3  ;;  %p1917_p9 = scmp.ge.s32.totalorder %s1444_s17, 1 }
  0x39   : > { %s1617_s23 = scalar_lea.hbm %s1892_s0, %s1552_s30  ;;  %s190_s7 = scalar_lea.vmem [#allocation5], %s1549_s29 }
  0x3a   : > { %p1609_p11 = pnand %p1917_p9, %p1916_p8  ;;  %s200_s28 = sshll.u32 %s190_s7, 4  ;;  %s1620_s28 = int_to_ptr.vmem [resolvable:$true] %s200_s28 }
  0x3b   : > { %s1626_s19 = scalar_lea.hbm %s1894_s2, %s1552_s30  ;;  %s1919_s6 = sand.u32 1, %s1432_s14  }
  0x3c   : > { %s1918_s9 = scalar_select %p1609_p11, 1, 0 }
  0x3d   : > { %s1630_s1 = scalar_lea.sflag [#allocation6], %s1919_s6  ;;  %s1298_s20 = scalar_lea.hbm %s1617_s23, 256 }
  0x3e   : > { %p1299_p12 = scmp.ne.s32.totalorder %s1617_s23, %s1298_s20  ;;  %s1303_s16 = scalar_lea.hbm %s1892_s0, 512 }
  0x3f   : > { %p1304_p6 = scmp.lt.u32.totalorder %s1617_s23, %s1892_s0  ;;  %p1305_p13 = scmp.lt.u32.totalorder %s1303_s16, %s1298_s20 }
  0x40   : > { %p1301_p1 = pnand %p1299_p12, %p1578_p4  ;;  %p1307_p5 = scmp.lt.u32.totalorder %s1298_s20, %s1617_s23 }
  0x41   : > { %p1306_p3 = por %p1305_p13, %p1304_p6 }
  0x42   : > { %p1302_p2 = pneg %p1301_p1 }
  0x43   : > { %p1308_p7 = por %p1307_p5, %p1306_p3 }
  0x45   : > { %p1309_p10 = pnand %p1308_p7, %p1302_p2 }
  0x47   : > { %1312 = shalt.err (!%p1309_p10)
}
  0x48   : > { %s1313_s30 = scalar_lea.vmem %s1620_s28, 256  ;;  %s1449_s6 = smov [#allocation5]  }
  0x49   : > { %p1314_p8 = scmp.ne.s32.totalorder %s1620_s28, %s1313_s30  ;;  %s1318_s8 = sshll.u32 %s1449_s6, 4  ;;  %s1319_s8 = int_to_ptr.vmem [resolvable:$false] %s1318_s8 }
  0x4a   : > { %s1320_s26 = scalar_lea.vmem %s1319_s8, 512  ;;  %p1321_p1 = scmp.lt.s32.totalorder %s1620_s28, %s1319_s8 }
  0x4b   : > { %p1316_p9 = pnand %p1314_p8, %p1578_p4  ;;  %p1322_p11 = scmp.lt.s32.totalorder %s1320_s26, %s1313_s30 }
  0x4d   : > { %p1317_p12 = pneg %p1316_p9  ;;  %p1323_p6 = por %p1322_p11, %p1321_p1 }
  0x4f   : > { %p1324_p13 = pnand %p1323_p6, %p1317_p12 }
  0x51   : > { %1327 = shalt.err (!%p1324_p13)
}
  0x52   : > { %s1920_s16 = smov 4   ;;  %s1921_s20 = smov 64  }
  0x53   : > { %1173 = dma.hbm_to_vmem [thread:$0]  (!%p1556_p0), %s1617_s23, 256, %s1620_s28, %s1630_s1, %s1921_s20, %s1921_s20, %s1920_s16  }
  0x54   : > { %s238_s10 = scalar_lea.vmem [#allocation10], %s1549_s29  ;;  %s1328_s22 = scalar_lea.hbm %s1626_s19, 256 }
  0x55   : > { %s248_s5 = sshll.u32 %s238_s10, 4  ;;  %p1329_p11 = scmp.ne.s32.totalorder %s1626_s19, %s1328_s22  ;;  %s1658_s5 = int_to_ptr.vmem [resolvable:$true] %s248_s5 }
  0x56   : > { %s1333_s6 = scalar_lea.hbm %s1894_s2, 512  ;;  %p1334_p5 = scmp.lt.u32.totalorder %s1626_s19, %s1894_s2 }
  0x57   : > { %p1331_p2 = pnand %p1329_p11, %p1578_p4  ;;  %p1335_p7 = scmp.lt.u32.totalorder %s1333_s6, %s1328_s22 }
  0x58   : > { %p1337_p8 = scmp.lt.u32.totalorder %s1328_s22, %s1626_s19 }
  0x59   : > { %p1332_p3 = pneg %p1331_p2  ;;  %p1336_p10 = por %p1335_p7, %p1334_p5 }
  0x5b   : > { %p1338_p9 = por %p1337_p8, %p1336_p10 }
  0x5d   : > { %p1339_p12 = pnand %p1338_p9, %p1332_p3 }
  0x5f   : > { %1342 = shalt.err (!%p1339_p12)
}
  0x60   : > { %s1343_s1 = scalar_lea.vmem %s1658_s5, 256  ;;  %s1450_s28 = smov [#allocation10]  }
  0x61   : > { %p1344_p1 = scmp.ne.s32.totalorder %s1658_s5, %s1343_s1  ;;  %s1348_s29 = sshll.u32 %s1450_s28, 4  ;;  %s1349_s29 = int_to_ptr.vmem [resolvable:$false] %s1348_s29 }
  0x62   : > { %s1350_s23 = scalar_lea.vmem %s1349_s29, 512  ;;  %p1351_p11 = scmp.lt.s32.totalorder %s1658_s5, %s1349_s29 }
  0x63   : > { %p1346_p6 = pnand %p1344_p1, %p1578_p4  ;;  %p1352_p2 = scmp.lt.s32.totalorder %s1350_s23, %s1343_s1 }
  0x65   : > { %p1347_p13 = pneg %p1346_p6  ;;  %p1353_p5 = por %p1352_p2, %p1351_p11 }
  0x67   : > { %p1354_p7 = pnand %p1353_p5, %p1347_p13 }
  0x69   : > { %1357 = shalt.err (!%p1354_p7)
}
  0x6a   : > { %1179 = dma.hbm_to_vmem [thread:$0]  (!%p1556_p0), %s1626_s19, 256, %s1658_s5, %s1572_s11, %s1921_s20, %s1921_s20, %s1920_s16  }
  0x6b   : > { %p1922_p4 = scmp.ne.s32.totalorder %s1918_s9, 0 }
  0x6c   : > { %s1688_s21 = sand.u32 (!%p1922_p4), 1, %s1428_s13   ;;  %p1923_p3 = scmp.ne.s32.totalorder (!%p1922_p4), %s1909_s24, 0 }
  0x6d   : > { %260 = sbr.rel (%p1922_p4) target bundleno = 951 (0x3b7), region = 32  ;;  %s1691_s10 = sshll.u32 (!%p1922_p4), %s1688_s21, 4 }
  0x6e   : > { %s263_s4 = scalar_lea.sflag (!%p1922_p4), [#allocation6], %s1688_s21  ;;  %s1695_s22 = scalar_lea.vmem (!%p1922_p4), [#allocation5], %s1691_s10 }
  0x74   : > { %1411 = dma.done.wait (%p1923_p3), %s263_s4, 256  }
  0x75   : > { %1413 = vsyncadd (%p1923_p3), %s263_s4, 4294967040  ;;  %s271_s11 = sand.u32 1, %s1509_s18   ;;  %s275_s9 = scalar_lea.vmem [#allocation8], %s1691_s10 }
  0x76   : > { %s272_s19 = scalar_lea.sflag [#allocation9], %s271_s11 }
  0x77   : > { %1415 = dma.done.wait (%p1923_p3), %s272_s19, 512  }
  0x78   : > { %1417 = vsyncadd (%p1923_p3), %s272_s19, 4294966784  ;;  %vm335_vm0 = vcmask 130048   ;;  %v1451_v0 = vmov 0.0   ;;  %vm1452_vm1 = vmmov 0   ;;  %v344_v1 = vld [vmem:[%s275_s9] sm:$0xf] }
  0x79   : > { %1114 = vmatprep.subr.bf16.mxu0 %v1451_v0  ;;  %336 = vst.msk [vmem:[#allocation4] sm:$0xff] %vm335_vm0, %v1451_v0  ;;  %337 = vst.msk [vmem:[#allocation4 + $0x8] sm:$0xff] %vm335_vm0, %v1451_v0  ;;  %1120 = vmatprep.subr.bf16.mxu1 %v1451_v0  ;;  %v345_v2 = vld [vmem:[%s275_s9 + $0x4] sm:$0xf]  ;;  %v357_v3 = vsel %vm335_vm0, %v344_v1, 0  ;;  %vm326_vm2 = vcmask 7168  }
  0x7a   : > { %338 = vst.msk [vmem:[#allocation4 + $0x10] sm:$0xff] %vm335_vm0, %v1451_v0  ;;  %339 = vst.msk [vmem:[#allocation4 + $0x18] sm:$0xff] %vm335_vm0, %v1451_v0  ;;  %1116 = vmatprep.mubr.msk.bf16.mxu0 %vm1452_vm1, %v1451_v0  ;;  %1122 = vmatprep.mubr.msk.bf16.mxu1 %vm1452_vm1, %v1451_v0  ;;  %v403_v4 = vsel %vm335_vm0, %v345_v2, 0  ;;  %v346_v5 = vld [vmem:[%s275_s9 + $0x8] sm:$0xf]  ;;  %v1453_v13 = vmov -inf  }
  0x7b   : > { %1115 = vmatpush3.bf16.xpose.msra.mxu0 %v357_v3  ;;  %1121 = vmatpush3.bf16.xpose.msra.mxu1 %v403_v4  ;;  %v347_v6 = vld [vmem:[%s275_s9 + $0xc] sm:$0xf]  ;;  %v340_v7 = vld [vmem:[%s1695_s22] sm:$0xf]  ;;  %v341_v8 = vld [vmem:[%s1695_s22 + $0x4] sm:$0xf] }
  0x7c   : > { %1126 = vmatprep.subr.bf16.mxu0 %v1451_v0  ;;  %1132 = vmatprep.subr.bf16.mxu1 %v1451_v0  ;;  %v449_v9 = vsel %vm335_vm0, %v346_v5, 0  ;;  %v495_v10 = vsel %vm335_vm0, %v347_v6, 0  ;;  %v342_v11 = vld [vmem:[%s1695_s22 + $0x8] sm:$0xf]  ;;  %v343_v12 = vld [vmem:[%s1695_s22 + $0xc] sm:$0xf] }
  0x7d   : > { %327 = vst.msk [vmem:[#allocation2] sm:$0xff] %vm326_vm2, %v1453_v13  ;;  %328 = vst.msk [vmem:[#allocation2 + $0x8] sm:$0xff] %vm326_vm2, %v1453_v13  ;;  %vm541_vm3 = vcmask 64512   ;;  %v1454_v34 = vmov 0   ;;  %s284_s18 = scalar_lea.vmem [#allocation10], %s1691_s10  ;;  %vm658_vm4 = vcmask 1043456  }
  0x7e   : > { %329 = vst.msk [vmem:[#allocation2 + $0x10] sm:$0xff] %vm326_vm2, %v1453_v13  ;;  %330 = vst.msk [vmem:[#allocation2 + $0x18] sm:$0xff] %vm326_vm2, %v1453_v13  ;;  %1242 = vset.pattern.permute.xlu0 %v1454_v34  ;;  %1243 = vset.pattern.permute.xlu1 %v1454_v34  ;;  %v348_v50 = vld [vmem:[%s284_s18] sm:$0xf]  ;;  %v349_v53 = vld [vmem:[%s284_s18 + $0x4] sm:$0xf] }
  0x7f   : > { %331 = vst.msk [vmem:[#allocation3] sm:$0xff] %vm326_vm2, %v1451_v0  ;;  %332 = vst.msk [vmem:[#allocation3 + $0x8] sm:$0xff] %vm326_vm2, %v1451_v0  ;;  %v660_v51 = vsel %vm658_vm4, %v348_v50, 0  ;;  %v706_v54 = vsel %vm658_vm4, %v349_v53, 0  ;;  %v350_v55 = vld [vmem:[%s284_s18 + $0x8] sm:$0xf] }
  0x80   : > { %333 = vst.msk [vmem:[#allocation3 + $0x10] sm:$0xff] %vm326_vm2, %v1451_v0  ;;  %334 = vst.msk [vmem:[#allocation3 + $0x18] sm:$0xff] %vm326_vm2, %v1451_v0  ;;  %v752_v56 = vsel %vm658_vm4, %v350_v55, 0  ;;  %v351_v57 = vld [vmem:[%s284_s18 + $0xc] sm:$0xf]  ;;  %vm895_vm5 = vcmask 125952  }
  0x81   : > { %v798_v58 = vsel %vm658_vm4, %v351_v57, 0  ;;  %v625_v55 = vld [vmem:[#allocation4 + $0x10] sm:$0xff]  ;;  %s316_s24 = scalar_lea.vmem [#allocation11], %s1691_s10  ;;  %s1097_s20 = sshll.u32 %s1436_s15, 8 }
  0x82   : > { %1117 = vmatmul.mubr.msk.bf16.vlgmr.msra.gmra.mrb[0].mxu0 %vm335_vm0, %v340_v7  ;;  %1123 = vmatmul.mubr.msk.bf16.vlgmr.msra.gmra.mrb[0].mxu1 %vm335_vm0, %v341_v8  ;;  %s917_s16 = sshll.u32 %s316_s24, 4  ;;  %s1842_s30 = scalar_lea.hbm %s1895_s3, %s1097_s20  ;;  %s1836_s16 = int_to_ptr.vmem [resolvable:$true] %s917_s16 }
  0x83   : > { %1127 = vmatpush3.bf16.xpose.msra.mxu0 %v449_v9  ;;  %1133 = vmatpush3.bf16.xpose.msra.mxu1 %v495_v10  ;;  %s901_s6 = scalar_lea.sflag [#allocation7], %s1688_s21  ;;  %s1358_s15 = scalar_lea.vmem %s1836_s16, 256 }
  0x84   : > { %1128 = vmatprep.mubr.msk.bf16.mxu0 %vm1452_vm1, %v1451_v0  ;;  %1134 = vmatprep.mubr.msk.bf16.mxu1 %vm1452_vm1, %v1451_v0  ;;  %v1770_v35 = vld [vmem:[#allocation2] sm:$0xff]  ;;  %v1775_v38 = vld [vmem:[#allocation2 + $0x8] sm:$0xff]  ;;  %p1359_p0 = scmp.ne.s32.totalorder %s1836_s16, %s1358_s15  ;;  %p1924_p10 = scmp.ne.s32.totalorder %s1910_s25, 0 }
  0x85   : > { %1138 = vmatprep.subr.bf16.mxu0 %v1451_v0  ;;  %1144 = vmatprep.subr.bf16.mxu1 %v1451_v0  ;;  %v1785_v42 = vld [vmem:[#allocation2 + $0x10] sm:$0xff]  ;;  %v1793_v46 = vld [vmem:[#allocation2 + $0x18] sm:$0xff]  ;;  %s1455_s8 = smov [#allocation11]  }
  0x86   : > { %p1360_p8 = pnand %p1359_p0, %p1924_p10  ;;  %s1362_s26 = sshll.u32 %s1455_s8, 4  ;;  %s1363_s26 = int_to_ptr.vmem [resolvable:$false] %s1362_s26 }
  0x87   : > { %s1364_s1 = scalar_lea.vmem %s1363_s26, 512  ;;  %p1365_p12 = scmp.lt.s32.totalorder %s1836_s16, %s1363_s26 }
  0x88   : > { %p1361_p9 = pneg %p1360_p8  ;;  %p1366_p1 = scmp.lt.s32.totalorder %s1364_s1, %s1358_s15 }
  0x8a   : > { %1129 = vmatmul.mubr.msk.bf16.vlgmr.msra.gmra.mrb[4].mxu0 %vm335_vm0, %v342_v11  ;;  %1135 = vmatmul.mubr.msk.bf16.vlgmr.msra.gmra.mrb[4].mxu1 %vm335_vm0, %v343_v12  ;;  %p1367_p6 = por %p1366_p1, %p1365_p12 }
  0x8b   : > { %1140 = vmatprep.mubr.msk.bf16.mxu0 %vm1452_vm1, %v1451_v0  ;;  %1146 = vmatprep.mubr.msk.bf16.mxu1 %vm1452_vm1, %v1451_v0 }
  0x8c   : > { %1139 = vmatpush3.bf16.msra.mxu0 %v660_v51  ;;  %1145 = vmatpush3.bf16.msra.mxu1 %v706_v54  ;;  %p1368_p13 = pnand %p1367_p6, %p1361_p9 }
  0x8d   : > { %1150 = vmatprep.subr.bf16.mxu0 %v1451_v0  ;;  %1156 = vmatprep.subr.bf16.mxu1 %v1451_v0 }
 0x155   : > { %v1757_v14 = vpop.f32.mrb[0].mxu0  ;;  %v1759_v15 = vpop.f32.mrb[0].mxu1 }
 0x156   : > { %v1118_v16 = vpop.f32.mrb[1].mxu0  ;;  %v542_v17 = vsel %vm541_vm3, %v1757_v14, -inf  ;;  %v1124_v18 = vpop.f32.mrb[1].mxu1  ;;  %v545_v23 = vsel %vm541_vm3, %v1759_v15, -inf }
 0x157   : > { %543 = vmax.xlane.f32.xlu0 %v542_v17  ;;  %v396_v19 = vpop.f32.mrb[2].mxu0  ;;  %v442_v20 = vpop.f32.mrb[2].mxu1 }
 0x158   : > { %v1119_v21 = vpop.f32.mrb[3].mxu0  ;;  %v1125_v22 = vpop.f32.mrb[3].mxu1  ;;  %v594_v19 = vld [vmem:[#allocation3] sm:$0xff] }
 0x159   : > { %v595_v22 = vld [vmem:[#allocation3 + $0x8] sm:$0xff] }
 0x15b   : > { %546 = vmax.xlane.f32.xlu0 %v545_v23 }
 0x15d   : > { %v485_v24 = vpop.f32.mrb[4].mxu0  ;;  %v1765_v25 = vpop.f32.mrb[4].mxu1 }
 0x15e   : > { %v1130_v26 = vpop.f32.mrb[5].mxu0  ;;  %v548_v27 = vsel %vm541_vm3, %v485_v24, -inf  ;;  %v1136_v28 = vpop.f32.mrb[5].mxu1  ;;  %v551_v33 = vsel %vm541_vm3, %v1765_v25, -inf }
 0x15f   : > { %549 = vmax.xlane.f32.xlu1 %v548_v27  ;;  %v488_v29 = vpop.f32.mrb[6].mxu0  ;;  %v534_v30 = vpop.f32.mrb[6].mxu1  ;;  %v596_v26 = vld [vmem:[#allocation3 + $0x10] sm:$0xff] }
 0x160   : > { %v1131_v31 = vpop.f32.mrb[7].mxu0  ;;  %v1137_v32 = vpop.f32.mrb[7].mxu1  ;;  %v597_v30 = vld [vmem:[#allocation3 + $0x18] sm:$0xff] }
 0x163   : > { %552 = vmax.xlane.f32.xlu1 %v551_v33 }
 0x1e4   : > { %v544_v36 = vpop.xlane.xlu0 %543 }
 0x1e5   : > { %v1773_v37 = vmax.f32 %v1770_v35, %v544_v36 }
 0x1e7   : > { %v558_v39 = vsub.f32 %v1770_v35, %v1773_v37  ;;  %848 = vst.msk [vmem:[#allocation2] sm:$0xff] %vm326_vm2, %v1773_v37  ;;  %568 = vperm.xlu0 %1242, %v1773_v37  }
 0x1e8   : > { %v547_v40 = vpop.xlane.xlu0 %546 }
 0x1e9   : > { %v1783_v41 = vmax.f32 %v1775_v38, %v547_v40 }
 0x1eb   : > { %v559_v43 = vsub.f32 %v1775_v38, %v1783_v41  ;;  %849 = vst.msk [vmem:[#allocation2 + $0x8] sm:$0xff] %vm326_vm2, %v1783_v41  ;;  %573 = vperm.xlu1 %1243, %v1783_v41  }
 0x1ec   : > { %v550_v44 = vpop.xlane.xlu1 %549 }
 0x1ed   : > { %v556_v45 = vmax.f32 %v1785_v42, %v550_v44 }
 0x1ef   : > { %v560_v47 = vsub.f32 %v1785_v42, %v556_v45  ;;  %850 = vst.msk [vmem:[#allocation2 + $0x10] sm:$0xff] %vm326_vm2, %v556_v45  ;;  %578 = vperm.xlu1 %1243, %v556_v45  }
 0x1f0   : > { %v553_v48 = vpop.xlane.xlu1 %552 }
 0x1f1   : > { %v557_v49 = vmax.f32 %v1793_v46, %v553_v48 }
 0x1f3   : > { %v561_v52 = vsub.f32 %v1793_v46, %v557_v49  ;;  %851 = vst.msk [vmem:[#allocation2 + $0x18] sm:$0xff] %vm326_vm2, %v557_v49  ;;  %583 = vperm.xlu1 %1243, %v557_v49   ;;  %v624_v46 = vld [vmem:[#allocation4 + $0x8] sm:$0xff] }
 0x266   : > { %v569_v59 = vpop.permute.xlu0 %568 }
 0x267   : > { %v586_v60 = vsub.f32 %v1757_v14, %v569_v59 }
 0x269   : > { %1244 = vpow2.f32 %v586_v60 }
 0x26a   : > { %v574_v61 = vpop.permute.xlu1 %573 }
 0x26b   : > { %v587_v62 = vsub.f32 %v1759_v15, %v574_v61 }
 0x26d   : > { %1246 = vpow2.f32 %v587_v62  ;;  %v626_v62 = vld [vmem:[#allocation4 + $0x18] sm:$0xff] }
 0x26e   : > { %v579_v63 = vpop.permute.xlu1 %578 }
 0x26f   : > { %v588_v1 = vsub.f32 %v485_v24, %v579_v63 }
 0x271   : > { %1248 = vpow2.f32 %v588_v1 }
 0x272   : > { %v584_v2 = vpop.permute.xlu1 %583 }
 0x273   : > { %v1245_v3 = vpop.eup %1244  ;;  %v589_v4 = vsub.f32 %v1765_v25, %v584_v2 }
 0x274   : > { %v602_v5 = vsel %vm541_vm3, %v1245_v3, 0.0  ;;  %v651_v6 = vpack.c.bf16 %v1245_v3, %v1245_v3 }
 0x275   : > { %1250 = vpow2.f32 %v589_v4  ;;  %603 = vadd.xlane.f32.xlu1 %v602_v5 }
 0x276   : > { %1141 = vmatmul.mubr.msk.bf16.vlgmr.msra.gmra.mrb[8].mxu0 %vm541_vm3, %v651_v6  ;;  %1252 = vpow2.f32 %v559_v43  ;;  %v623_v43 = vld [vmem:[#allocation4] sm:$0xff] }
 0x277   : > { %v1247_v7 = vpop.eup %1246  ;;  %1151 = vmatpush3.bf16.msra.mxu0 %v752_v56  ;;  %1152 = vmatprep.mubr.msk.bf16.mxu0 %vm1452_vm1, %v1451_v0  ;;  %1254 = vpow2.f32 %v558_v39 }
 0x278   : > { %v605_v8 = vsel %vm541_vm3, %v1247_v7, 0.0  ;;  %v652_v9 = vpack.c.bf16 %v1247_v7, %v1247_v7  ;;  %1256 = vpow2.f32 %v560_v47 }
 0x279   : > { %606 = vadd.xlane.f32.xlu0 %v605_v8  ;;  %1258 = vpow2.f32 %v561_v52 }
 0x27a   : > { %1147 = vmatmul.mubr.msk.bf16.vlgmr.msra.gmra.mrb[8].mxu1 %vm541_vm3, %v652_v9 }
 0x27b   : > { %v1249_v10 = vpop.eup %1248  ;;  %1157 = vmatpush3.bf16.msra.mxu1 %v798_v58  ;;  %1158 = vmatprep.mubr.msk.bf16.mxu1 %vm1452_vm1, %v1451_v0 }
 0x27c   : > { %v608_v11 = vsel %vm541_vm3, %v1249_v10, 0.0  ;;  %v653_v12 = vpack.c.bf16 %v1249_v10, %v1249_v10 }
 0x27d   : > { %609 = vadd.xlane.f32.xlu1 %v608_v11 }
 0x27e   : > { %1153 = vmatmul.mubr.msk.bf16.vlgmr.msra.gmra.mrb[12].mxu0 %vm541_vm3, %v653_v12 }
 0x27f   : > { %v1251_v13 = vpop.eup %1250 }
 0x280   : > { %v611_v14 = vsel %vm541_vm3, %v1251_v13, 0.0  ;;  %v654_v15 = vpack.c.bf16 %v1251_v13, %v1251_v13  ;;  %v1253_v0 = vpop.eup %1252 }
 0x281   : > { %612 = vadd.xlane.f32.xlu1 %v611_v14  ;;  %v1255_v16 = vpop.eup %1254  ;;  %v599_v24 = vmul.f32 %v1253_v0, %v595_v22 }
 0x282   : > { %1159 = vmatmul.mubr.msk.bf16.vlgmr.msra.gmra.mrb[12].mxu1 %vm541_vm3, %v654_v15  ;;  %v1257_v17 = vpop.eup %1256  ;;  %v598_v20 = vmul.f32 %v1255_v16, %v594_v19 }
 0x283   : > { %v1259_v18 = vpop.eup %1258  ;;  %v600_v28 = vmul.f32 %v1257_v17, %v596_v26 }
 0x284   : > { %v601_v33 = vmul.f32 %v1259_v18, %v597_v30 }
 0x28f   : > { %634 = vperm.xlu0 %1242, %v1253_v0  }
 0x292   : > { %629 = vperm.xlu1 %1243, %v1255_v16  }
 0x296   : > { %639 = vperm.xlu1 %1243, %v1257_v17  }
 0x29a   : > { %644 = vperm.xlu1 %1243, %v1259_v18  }
 0x302   : > { %v604_v21 = vpop.xlane.xlu1 %603 }
 0x303   : > { %v614_v23 = vadd.f32 %v604_v21, %v598_v20 }
 0x305   : > { %619 = vst.msk [vmem:[#allocation3] sm:$0xff] %vm326_vm2, %v614_v23 }
 0x306   : > { %v607_v25 = vpop.xlane.xlu0 %606 }
 0x307   : > { %v615_v27 = vadd.f32 %v607_v25, %v599_v24 }
 0x309   : > { %620 = vst.msk [vmem:[#allocation3 + $0x8] sm:$0xff] %vm326_vm2, %v615_v27 }
 0x30a   : > { %v610_v29 = vpop.xlane.xlu1 %609 }
 0x30b   : > { %v616_v31 = vadd.f32 %v610_v29, %v600_v28 }
 0x30c   : > { %v855_v32 = vld [vmem:[#allocation3] sm:$0xff] }
 0x30d   : > { %621 = vst.msk [vmem:[#allocation3 + $0x10] sm:$0xff] %vm326_vm2, %v616_v31  ;;  %1260 = vrcp.f32 %v855_v32 }
 0x30e   : > { %v613_v34 = vpop.xlane.xlu1 %612  ;;  %v635_v47 = vpop.permute.xlu0 %634 }
 0x30f   : > { %v617_v35 = vadd.f32 %v613_v34, %v601_v33  ;;  %v648_v53 = vmul.f32 %v635_v47, %v624_v46 }
 0x310   : > { %v856_v36 = vld [vmem:[#allocation3 + $0x8] sm:$0xff] }
 0x311   : > { %622 = vst.msk [vmem:[#allocation3 + $0x18] sm:$0xff] %vm326_vm2, %v617_v35  ;;  %1262 = vrcp.f32 %v856_v36 }
 0x312   : > { %v630_v44 = vpop.permute.xlu1 %629 }
 0x313   : > { %v647_v45 = vmul.f32 %v630_v44, %v623_v43 }
 0x314   : > { %v857_v37 = vld [vmem:[#allocation3 + $0x10] sm:$0xff] }
 0x315   : > { %1264 = vrcp.f32 %v857_v37 }
 0x316   : > { %v640_v51 = vpop.permute.xlu1 %639 }
 0x317   : > { %v1261_v38 = vpop.eup %1260  ;;  %v649_v60 = vmul.f32 %v640_v51, %v625_v55 }
 0x318   : > { %869 = vperm.xlu1 %1243, %v1261_v38   ;;  %v858_v39 = vld [vmem:[#allocation3 + $0x18] sm:$0xff] }
 0x319   : > { %1266 = vrcp.f32 %v858_v39 }
 0x31a   : > { %v645_v63 = vpop.permute.xlu1 %644 }
 0x31b   : > { %v1263_v40 = vpop.eup %1262  ;;  %v650_v5 = vmul.f32 %v645_v63, %v626_v62 }
 0x31c   : > { %874 = vperm.xlu0 %1242, %v1263_v40  }
 0x31f   : > { %v1265_v41 = vpop.eup %1264 }
 0x320   : > { %879 = vperm.xlu1 %1243, %v1265_v41  }
 0x323   : > { %v1267_v42 = vpop.eup %1266 }
 0x324   : > { %884 = vperm.xlu0 %1242, %v1267_v42  }
 0x349   : > { %v696_v48 = vpop.f32.mrb[8].mxu0 }
 0x34a   : > { %v840_v49 = vadd.f32 %v696_v48, %v647_v45  ;;  %v1142_v50 = vpop.f32.mrb[9].mxu0 }
 0x34b   : > { %v699_v52 = vpop.f32.mrb[10].mxu0 }
 0x34c   : > { %844 = vst.msk [vmem:[#allocation4] sm:$0xff] %vm335_vm0, %v840_v49  ;;  %v1143_v54 = vpop.f32.mrb[11].mxu0 }
 0x34d   : > { %v742_v56 = vpop.f32.mrb[8].mxu1 }
 0x34e   : > { %v841_v57 = vadd.f32 %v742_v56, %v648_v53  ;;  %v1148_v58 = vpop.f32.mrb[9].mxu1 }
 0x34f   : > { %v745_v59 = vpop.f32.mrb[10].mxu1 }
 0x350   : > { %845 = vst.msk [vmem:[#allocation4 + $0x8] sm:$0xff] %vm335_vm0, %v841_v57  ;;  %v1149_v61 = vpop.f32.mrb[11].mxu1 }
 0x351   : > { %v788_v1 = vpop.f32.mrb[12].mxu0 }
 0x352   : > { %v842_v2 = vadd.f32 %v788_v1, %v649_v60  ;;  %v1154_v3 = vpop.f32.mrb[13].mxu0 }
 0x353   : > { %v791_v4 = vpop.f32.mrb[14].mxu0  ;;  %v863_v12 = vld [vmem:[#allocation4] sm:$0xff] }
 0x354   : > { %846 = vst.msk [vmem:[#allocation4 + $0x10] sm:$0xff] %vm335_vm0, %v842_v2  ;;  %v1155_v6 = vpop.f32.mrb[15].mxu0 }
 0x355   : > { %v834_v7 = vpop.f32.mrb[12].mxu1 }
 0x356   : > { %v843_v8 = vadd.f32 %v834_v7, %v650_v5  ;;  %v1160_v9 = vpop.f32.mrb[13].mxu1 }
 0x357   : > { %v837_v10 = vpop.f32.mrb[14].mxu1  ;;  %v864_v0 = vld [vmem:[#allocation4 + $0x8] sm:$0xff] }
 0x358   : > { %847 = vst.msk [vmem:[#allocation4 + $0x18] sm:$0xff] %vm335_vm0, %v843_v8  ;;  %v1161_v11 = vpop.f32.mrb[15].mxu1 }
 0x35b   : > { %v865_v19 = vld [vmem:[#allocation4 + $0x10] sm:$0xff] }
 0x35f   : > { %v866_v24 = vld [vmem:[#allocation4 + $0x18] sm:$0xff] }
 0x397   : > { %v870_v13 = vpop.permute.xlu1 %869 }
 0x398   : > { %v887_v14 = vmul.f32 %v870_v13, %v863_v12 }
 0x39a   : > { %v891_v15 = vpack.c.bf16 %v887_v14, %v887_v14 }
 0x39b   : > { %v875_v16 = vpop.permute.xlu0 %874 }
 0x39c   : > { %896 = vst.msk [vmem:[%s316_s24] sm:$0xf] %vm895_vm5, %v891_v15  ;;  %v888_v17 = vmul.f32 %v875_v16, %v864_v0 }
 0x39e   : > { %v892_v18 = vpack.c.bf16 %v888_v17, %v888_v17 }
 0x39f   : > { %v880_v20 = vpop.permute.xlu1 %879 }
 0x3a0   : > { %897 = vst.msk [vmem:[%s316_s24 + $0x4] sm:$0xf] %vm895_vm5, %v892_v18  ;;  %v889_v21 = vmul.f32 %v880_v20, %v865_v19 }
 0x3a2   : > { %v893_v22 = vpack.c.bf16 %v889_v21, %v889_v21 }
 0x3a3   : > { %v885_v23 = vpop.permute.xlu0 %884 }
 0x3a4   : > { %898 = vst.msk [vmem:[%s316_s24 + $0x8] sm:$0xf] %vm895_vm5, %v893_v22  ;;  %v890_v25 = vmul.f32 %v885_v23, %v866_v24 }
 0x3a6   : > { %v894_v26 = vpack.c.bf16 %v890_v25, %v890_v25 }
 0x3a8   : > { %899 = vst.msk [vmem:[%s316_s24 + $0xc] sm:$0xf] %vm895_vm5, %v894_v26 }
 0x3a9   : > { %1371 = shalt.err (!%p1368_p13)
}
 0x3aa   : > { %s1372_s28 = scalar_lea.hbm %s1842_s30, 256  ;;  %s1376_s10 = scalar_lea.hbm %s1895_s3, 512 }
 0x3ab   : > { %p1373_p11 = scmp.ne.s32.totalorder %s1842_s30, %s1372_s28  ;;  %p1377_p7 = scmp.lt.u32.totalorder %s1842_s30, %s1895_s3 }
 0x3ac   : > { %p1378_p4 = scmp.lt.u32.totalorder %s1376_s10, %s1372_s28  ;;  %p1380_p0 = scmp.lt.u32.totalorder %s1372_s28, %s1842_s30 }
 0x3ad   : > { %p1374_p2 = pnand %p1373_p11, %p1924_p10 }
 0x3ae   : > { %p1379_p3 = por %p1378_p4, %p1377_p7 }
 0x3af   : > { %p1375_p5 = pneg %p1374_p2 }
 0x3b0   : > { %p1381_p8 = por %p1380_p0, %p1379_p3 }
 0x3b2   : > { %p1382_p9 = pnand %p1381_p8, %p1375_p5 }
 0x3b4   : > { %1385 = shalt.err (!%p1382_p9)
}
 0x3b5   : > { %s1456_s11 = smov 64   ;;  %s1457_s19 = smov 4  }
 0x3b6   : > { %1168 = dma.vmem_to_hbm [thread:$0]  (%p1924_p10), %s1836_s16, 256, %s1842_s30, %s901_s6, %s1456_s11, %s1456_s11, %s1457_s19  }
 0x3b7 PF: > { %s932_s9 = sand.u32 1, %s1424_s12   ;;  %p1925_p12 = scmp.ne.s32.totalorder %s1912_s27, 0 }
 0x3b8   : > { %p1926_p1 = scmp.ge.s32.totalorder %s1444_s17, 2  ;;  %s933_s18 = scalar_lea.sflag [#allocation7], %s932_s9 }
 0x3ba   : > { %p1181_p6 = pnand %p1926_p1, %p1925_p12 }
 0x3bc   : > { %1419 = dma.done.wait (!%p1181_p6), %s933_s18, 256  }
 0x3bd   : > { %1421 = vsyncadd (!%p1181_p6), %s933_s18, 4294967040  ;;  %s22_s17 = sadd.s32 1, %s1444_s17   ;;  %s1927_s24 = sld [smem:[#allocation17_spill]] }
 0x3be   : > { %p19_p13 = scmp.ge.s32.totalorder %s22_s17, 4   ;;  %s1928_s15 = sld [smem:[#allocation15_spill]] }
 0x3bf   : > { %s1929_s16 = sld [smem:[#allocation16_spill]]  ;;  %s1930_s12 = smov %s1428_s13 }
 0x3c0   : > { %s1931_s13 = smov %s1432_s14  ;;  %21 = sbr.rel (!%p19_p13) target bundleno = 10 (0xa), region = 109 }
 0x3c3   : > { %s1932_s14 = smov %s1927_s24 }
 0x3c7   :  { %938 = vsyncpa [#allocation6], 1 }
 0x3c8   :  { %940 = vsyncpa [#allocation6 + $0x1], 1 }
 0x3c9   :  { %941 = vsyncpa [#allocation9], 1 }
 0x3ca   :  { %943 = vsyncpa [#allocation9 + $0x1], 1 }
 0x3cb   :  { %944 = vsyncpa [#allocation7], 1 }
 0x3cc   :  { %946 = vsyncpa [#allocation7 + $0x1], 1 }

</bundles_post_ra>
